<compile_context>
chip_gen: v7x
topology: tpu7x:2x2x1
jax: 0.10.0
libtpu: 0.0.40
codegen_flags: <defaults>
</compile_context>

<pallas_src>
import jax
import jax.numpy as jnp
from jax.experimental import pallas as pl
from jax.experimental.pallas import tpu as pltpu


# ---------------------------------------------------------------------------
# Kernels (elementwise, operate on one (tile_rows, lane) VMEM block)
# ---------------------------------------------------------------------------
def _diff_clamp_kernel(p_ref, x_ref, o_ref):
    # p_ref = [min, max, k] in SMEM (f32)
    # diff_clamp(x, _min, _max, k):
    #   x = minimum(x - max, (x - max) * k) + max
    #   x = maximum(x - min, (x - min) * k) + min
    x = x_ref[...].astype(jnp.float32)
    _min = p_ref[0]
    _max = p_ref[1]
    k = p_ref[2]
    x = jnp.minimum(x - _max, (x - _max) * k) + _max
    x = jnp.maximum(x - _min, (x - _min) * k) + _min
    o_ref[...] = x.astype(o_ref.dtype)


def _clamp_kernel(p_ref, x_ref, o_ref):
    # p_ref = [min, max] in SMEM (f32); torch.clamp(x, min, max)
    x = x_ref[...].astype(jnp.float32)
    o_ref[...] = jnp.clip(x, p_ref[0], p_ref[1]).astype(o_ref.dtype)


# ---------------------------------------------------------------------------
# Wrapper: lane-dense packing (pad-free when possible) + pipelined pallas_call
# ---------------------------------------------------------------------------
_TARGET_BLOCK_BYTES = 4 << 20   # ~4 MiB per input block (measured ~86% of HBM roofline)
_PALLAS_MIN_ELEMS = 1 << 17     # below this, pure-jnp fallback wins (launch-overhead regime)


def _choose_lane(n):
    """Pick a lane width (multiple of 128) and required pad for a flat length n."""
    for lane in (1024, 512, 256, 128):
        if n % lane == 0:
            return lane, 0
    lane = 128
    return lane, (-n) % lane


def _elementwise_call(kernel, x, params, flops_per_elem, jnp_fallback,
                      force_pallas=False):
    n = x.size
    if n == 0:
        return x
    if (not force_pallas) and n < _PALLAS_MIN_ELEMS:
        # Tiny-tensor path: XLA fuses this to a single HBM pass anyway.
        return jnp_fallback(x)

    orig_shape = x.shape
    itemsize = jnp.dtype(x.dtype).itemsize

    lane, pad_amount = _choose_lane(n)
    flat = x.reshape(-1)
    if pad_amount:
        flat = jnp.pad(flat, (0, pad_amount))          # only for truly ragged sizes
    rows = flat.shape[0] // lane
    x2 = flat.reshape(rows, lane)

    # Sublane multiple per dtype: f32 -> 8, bf16/f16 -> 16, int8/fp8 -> 32.
    sub = max(8, 32 // itemsize)
    max_tile_rows = max(sub, (_TARGET_BLOCK_BYTES // (lane * itemsize)) // sub * sub)

    if rows <= sub:
        # Block equals the full array dims (allowed even when < sublane multiple).
        tile_rows = rows
    elif rows <= max_tile_rows:
        # Fits in one max tile: split so grid >= 2 and v7x's two TCs both work.
        tile_rows = max(sub, pl.cdiv(pl.cdiv(rows, 2), sub) * sub)
    else:
        tile_rows = max_tile_rows
    grid = (pl.cdiv(rows, tile_rows),)   # ragged last tile handled by Pallas masking

    out2 = pl.pallas_call(
        kernel,
        out_shape=jax.ShapeDtypeStruct((rows, lane), x.dtype),
        grid=grid,
        in_specs=[
            pl.BlockSpec(memory_space=pltpu.SMEM),                 # params
            pl.BlockSpec((tile_rows, lane), lambda i: (i, 0)),     # x tile
        ],
        out_specs=pl.BlockSpec((tile_rows, lane), lambda i: (i, 0)),
        compiler_params=pltpu.CompilerParams(
            dimension_semantics=("parallel",),
            vmem_limit_bytes=32 << 20,   # 4 MiB blocks, <=16 MiB double-buffered in+out
        ),
        cost_estimate=pl.CostEstimate(
            flops=flops_per_elem * rows * lane,
            transcendentals=0,
            bytes_accessed=2 * rows * lane * itemsize,
        ),
    )(params, x2)

    if pad_amount:
        return out2.reshape(-1)[:n].reshape(orig_shape)
    return out2.reshape(orig_shape)


def pallas_diff_clamp(x, _min, _max, k=0.001, force_pallas=False):
    params = jnp.asarray([_min, _max, k], dtype=jnp.float32)

    def _fallback(v):
        vf = v.astype(jnp.float32)
        vf = jnp.minimum(vf - _max, (vf - _max) * k) + _max
        vf = jnp.maximum(vf - _min, (vf - _min) * k) + _min
        return vf.astype(v.dtype)

    # ~8 VPU ops per element (sub/mul/min/add x2)
    return _elementwise_call(_diff_clamp_kernel, x, params, 8, _fallback,
                             force_pallas=force_pallas)


def pallas_clamp(x, _min, _max, force_pallas=False):
    params = jnp.asarray([_min, _max], dtype=jnp.float32)

    def _fallback(v):
        return jnp.clip(v.astype(jnp.float32), _min, _max).astype(v.dtype)

    return _elementwise_call(_clamp_kernel, x, params, 2, _fallback,
                             force_pallas=force_pallas)


# ---------------------------------------------------------------------------
# Module equivalent
# ---------------------------------------------------------------------------
class ClipBase:
    """JAX/Pallas equivalent of basicgs.utils.hdr_util.ClipBase."""

    def __init__(self, clip=False):
        self._clip_func = pallas_clamp if clip else pallas_diff_clamp

    def do_clip(self):
        self._clip_func = pallas_clamp

    def dont_clip(self):
        self._clip_func = pallas_diff_clamp

    def forward(self, x):
        # Identity in the reference; return x directly (no copy kernel).
        return x

    def __call__(self, x):
        return self.forward(x)


# ---------------------------------------------------------------------------
# Pure-JAX references for correctness checks
# ---------------------------------------------------------------------------
def _ref_diff_clamp(x, _min, _max, k=0.001):
    x = jnp.minimum(x - _max, (x - _max) * k) + _max
    x = jnp.maximum(x - _min, (x - _min) * k) + _min
    return x


if __name__ == "__main__":
    k0, k1 = jax.random.split(jax.random.PRNGKey(0))
    # Small shape per module spec (uses the jnp fast path unless forced).
    x_small = jax.random.normal(k0, (2, 4, 16, 16), dtype=jnp.float32) * 2.0
    # Medium tensor to exercise the tiled, multi-step Pallas path.
    x_big = jax.random.normal(k1, (2, 4, 256, 256), dtype=jnp.float32) * 2.0

    mod = ClipBase(clip=False)
    _min, _max = 0.0, 1.0

    # forward: identity
    y = jax.block_until_ready(mod(x_small))
    assert y.shape == x_small.shape and y.dtype == x_small.dtype
    assert jnp.allclose(y, x_small), "forward (identity) mismatch"

    # diff_clamp (default, dont_clip mode) — small input via fallback path
    y_s = jax.block_until_ready(mod._clip_func(x_small, _min, _max))
    assert jnp.allclose(y_s, _ref_diff_clamp(x_small, _min, _max), atol=1e-6), \
        "diff_clamp (small/fallback) mismatch"

    # diff_clamp — small input forced through the Pallas kernel (ragged/1-tile path)
    y_sf = jax.block_until_ready(pallas_diff_clamp(x_small, _min, _max, force_pallas=True))
    assert jnp.allclose(y_sf, _ref_diff_clamp(x_small, _min, _max), atol=1e-6), \
        "diff_clamp (small/pallas) mismatch"

    # diff_clamp — medium input through the tiled Pallas kernel (multi-step grid)
    y_b = jax.block_until_ready(mod._clip_func(x_big, _min, _max))
    assert y_b.shape == x_big.shape and y_b.dtype == x_big.dtype
    assert jnp.allclose(y_b, _ref_diff_clamp(x_big, _min, _max), atol=1e-6), \
        "diff_clamp (big/pallas) mismatch"

    # hard clamp after do_clip()
    mod.do_clip()
    y_hb = jax.block_until_ready(mod._clip_func(x_big, _min, _max))
    assert jnp.allclose(y_hb, jnp.clip(x_big, _min, _max), atol=1e-6), \
        "clamp (big/pallas) mismatch"
    y_hs = jax.block_until_ready(pallas_clamp(x_small, _min, _max, force_pallas=True))
    assert jnp.allclose(y_hs, jnp.clip(x_small, _min, _max), atol=1e-6), \
        "clamp (small/pallas) mismatch"

    # dont_clip() switches back
    mod.dont_clip()
    y_s2 = jax.block_until_ready(mod._clip_func(x_big, _min, _max))
    assert jnp.allclose(y_s2, _ref_diff_clamp(x_big, _min, _max), atol=1e-6), \
        "dont_clip switch mismatch"

    print("KERNEL_OK")
</pallas_src>

<mosaic_0001>
module attributes {stable_mosaic.version = 11 : i64} {
  func.func @_diff_clamp_kernel(%arg0: i32, %arg1: memref<3xf32, #tpu.memory_space<smem>>, %arg2: memref<2x1024xf32, #tpu.memory_space<vmem>>, %arg3: memref<2x1024xf32, #tpu.memory_space<vmem>>) attributes {dimension_semantics = [#tpu.dimension_semantics<parallel>], iteration_bounds = array<i64: 1>, scalar_prefetch = 0 : i64, scratch_operands = 0 : i64, tpu.core_type = #tpu.core_type<tc>, window_params = [{transform_indices = @transform_0, window_bounds = array<i64: 3>}, {transform_indices = @transform_1, window_bounds = array<i64: 2, 1024>}, {transform_indices = @transform_2, window_bounds = array<i64: 2, 1024>}]} {
    %c0 = arith.constant 0 : index
    %c0_0 = arith.constant 0 : index
    %0 = vector.load %arg2[%c0, %c0_0] : memref<2x1024xf32, #tpu.memory_space<vmem>>, vector<2x1024xf32>
    %c0_1 = arith.constant 0 : index
    %1 = memref.load %arg1[%c0_1] : memref<3xf32, #tpu.memory_space<smem>>
    %c1 = arith.constant 1 : index
    %2 = memref.load %arg1[%c1] : memref<3xf32, #tpu.memory_space<smem>>
    %c2 = arith.constant 2 : index
    %3 = memref.load %arg1[%c2] : memref<3xf32, #tpu.memory_space<smem>>
    %4 = vector.broadcast %2 : f32 to vector<2x1024xf32>
    %5 = arith.subf %0, %4 : vector<2x1024xf32>
    %6 = vector.broadcast %2 : f32 to vector<2x1024xf32>
    %7 = arith.subf %0, %6 : vector<2x1024xf32>
    %8 = vector.broadcast %3 : f32 to vector<2x1024xf32>
    %9 = arith.mulf %7, %8 : vector<2x1024xf32>
    %10 = arith.minimumf %5, %9 : vector<2x1024xf32>
    %11 = vector.broadcast %2 : f32 to vector<2x1024xf32>
    %12 = arith.addf %10, %11 : vector<2x1024xf32>
    %13 = vector.broadcast %1 : f32 to vector<2x1024xf32>
    %14 = arith.subf %12, %13 : vector<2x1024xf32>
    %15 = vector.broadcast %1 : f32 to vector<2x1024xf32>
    %16 = arith.subf %12, %15 : vector<2x1024xf32>
    %17 = vector.broadcast %3 : f32 to vector<2x1024xf32>
    %18 = arith.mulf %16, %17 : vector<2x1024xf32>
    %19 = arith.maximumf %14, %18 : vector<2x1024xf32>
    %20 = vector.broadcast %1 : f32 to vector<2x1024xf32>
    %21 = arith.addf %19, %20 : vector<2x1024xf32>
    %c0_2 = arith.constant 0 : index
    %c0_3 = arith.constant 0 : index
    %22 = vector.load %arg3[%c0_2, %c0_3] : memref<2x1024xf32, #tpu.memory_space<vmem>>, vector<2x1024xf32>
    tpu.vector_store %arg3[%c0_2, %c0_3], %21 {strides = array<i32>} : memref<2x1024xf32, #tpu.memory_space<vmem>>, vector<2x1024xf32>,
    return
  }
  func.func @transform_0(%arg0: i32) -> i32 {
    %c0_i32 = arith.constant 0 : i32
    %c0_i32_0 = arith.constant 0 : i32
    return %c0_i32 : i32
  }
  func.func @transform_1(%arg0: i32) -> (i32, i32) {
    %c0_i32 = arith.constant 0 : i32
    %c0_i32_0 = arith.constant 0 : i32
    return %arg0, %c0_i32 : i32, i32
  }
  func.func @transform_2(%arg0: i32) -> (i32, i32) {
    %c0_i32 = arith.constant 0 : i32
    %c0_i32_0 = arith.constant 0 : i32
    return %arg0, %c0_i32 : i32, i32
  }
}

</mosaic_0001>

<bundles_post_ra>
// kernel: tpu_custom_call.1
= control target key start
LH: loop header
LB: loop body
LE: loop exit
PB: predicated region body
PF: predicated region fallthrough
CT: control target
= control target key end

     0   :  { %7 = vsyncpa [#allocation5], 0  ;;  %s196_s0 = inlined_call_operand.hbm [shape: f32[3], index: 0, kind: input, shape index: {}]   ;;  %s197_s1 = inlined_call_operand.hbm [shape: f32[2,1024], index: 1, kind: input, shape index: {}]   ;;  %s198_s2 = inlined_call_operand.hbm [shape: f32[2,1024], index: 2, kind: output, shape index: {}]  }
   0x1   :  { %8 = vsyncpa [#allocation3], 0 }
   0x2   :  { %9 = vsyncpa [#allocation4], 0  ;;  %s82_s11 = scalar_lea.hbm %s196_s0, 16 }
   0x3   :  { %p83_p0 = scmp.ne.s32.totalorder %s196_s0, %s82_s11  ;;  %p86_p1 = scmp.lt.u32.totalorder %s82_s11, %s196_s0 }
   0x5   :  { %p88_p2 = pnand %p86_p1, %p83_p0 }
   0x7   :  { %91 = shalt.err (!%p88_p2)
}
   0x8   :  { %s142_s16 = smov [#allocation2]   ;;  %s143_s19 = smov [#allocation6]  }
   0x9   :  { %17 = dma.hbm_to_smem %s196_s0, 16, %s142_s16, [#allocation5]  }
   0xa   :  { %s24_s20 = sshll.u32 %s143_s19, 4  ;;  %s92_s23 = scalar_lea.hbm %s197_s1, 256  ;;  %s25_s20 = int_to_ptr.vmem [resolvable:$true] %s24_s20 }
   0xb   :  { %p93_p3 = scmp.ne.s32.totalorder %s197_s1, %s92_s23  ;;  %p96_p4 = scmp.lt.u32.totalorder %s92_s23, %s197_s1 }
   0xd   :  { %p98_p5 = pnand %p96_p4, %p93_p3 }
   0xf   :  { %101 = shalt.err (!%p98_p5)
}
  0x10   :  { %s102_s28 = scalar_lea.vmem %s25_s20, 256  ;;  %p107_p7 = scmp.lt.s32.totalorder %s25_s20, %s25_s20 }
  0x11   :  { %p103_p6 = scmp.ne.s32.totalorder %s25_s20, %s102_s28  ;;  %p108_p8 = scmp.lt.s32.totalorder %s102_s28, %s102_s28 }
  0x13   :  { %p109_p9 = por %p108_p8, %p107_p7 }
  0x15   :  { %p110_p10 = pnand %p109_p9, %p103_p6 }
  0x17   :  { %113 = shalt.err (!%p110_p10)
}
  0x18   :  { %27 = dma.hbm_to_vmem [thread:$0]  %s197_s1, 256, %s25_s20, [#allocation3]  }
  0x19   :  { %136 = dma.done.wait [#allocation5], 16  }
  0x1a   :  { %137 = vsyncadd [#allocation5], 4294967280 }
  0x1b   :  { %138 = dma.done.wait [#allocation3], 256  }
  0x1c   :  { %139 = vsyncadd [#allocation3], 4294967040 }
  0x1d   :  { %34 = sfence }
  0x1e   :  { %s77_s30 = sld [smem:[#allocation2 + $0x1]]  ;;  %s78_s3 = sld [smem:[#allocation2 + $0x2]]  ;;  %v35_v0 = vld [vmem:[#allocation6] sm:$0xff]  ;;  %v36_v1 = vld [vmem:[#allocation6 + $0x8] sm:$0xff] }
  0x1f   :  { %s37_s4 = sld [smem:[#allocation2]]  ;;  %s144_s1 = smov [#allocation7]  }
  0x20   :  { %s67_s5 = sshll.u32 %s144_s1, 4  ;;  %s68_s5 = int_to_ptr.vmem [resolvable:$true] %s67_s5 }
  0x21   :  { %s114_s6 = scalar_lea.vmem %s68_s5, 256  ;;  %p119_p12 = scmp.lt.s32.totalorder %s68_s5, %s68_s5 }
  0x22   :  { %p115_p11 = scmp.ne.s32.totalorder %s68_s5, %s114_s6  ;;  %p120_p13 = scmp.lt.s32.totalorder %s114_s6, %s114_s6 }
  0x24   :  { %v40_v2 = vstv %s77_s30  ;;  %v43_v4 = vstv %s78_s3  ;;  %p121_p0 = por %p120_p13, %p119_p12 }
  0x25   :  { %v41_v3 = vsub.f32 %v35_v0, %v40_v2  ;;  %v42_v5 = vsub.f32 %v36_v1, %v40_v2  ;;  %v50_v10 = vstv %s37_s4 }
  0x26   :  { %p122_p1 = pnand %p121_p0, %p115_p11 }
  0x27   :  { %v44_v6 = vmul.f32 %v43_v4, %v41_v3  ;;  %v45_v7 = vmul.f32 %v43_v4, %v42_v5 }
  0x29   :  { %v46_v8 = vmin.f32 %v41_v3, %v44_v6  ;;  %v47_v9 = vmin.f32 %v42_v5, %v45_v7 }
  0x2b   :  { %v48_v11 = vadd.f32 %v46_v8, %v40_v2  ;;  %v49_v12 = vadd.f32 %v47_v9, %v40_v2 }
  0x2d   :  { %v51_v13 = vsub.f32 %v48_v11, %v50_v10  ;;  %v52_v14 = vsub.f32 %v49_v12, %v50_v10 }
  0x2f   :  { %v53_v15 = vmul.f32 %v51_v13, %v43_v4  ;;  %v54_v16 = vmul.f32 %v52_v14, %v43_v4 }
  0x31   :  { %v55_v17 = vmax.f32 %v51_v13, %v53_v15  ;;  %v56_v18 = vmax.f32 %v52_v14, %v54_v16 }
  0x33   :  { %v57_v19 = vadd.f32 %v55_v17, %v50_v10  ;;  %v58_v20 = vadd.f32 %v56_v18, %v50_v10 }
  0x35   :  { %59 = vst [vmem:[#allocation7] sm:$0xff] %v57_v19  ;;  %60 = vst [vmem:[#allocation7 + $0x8] sm:$0xff] %v58_v20 }
  0x36   :  { %125 = shalt.err (!%p122_p1)
}
  0x37   :  { %s126_s9 = scalar_lea.hbm %s198_s2, 256 }
  0x38   :  { %p127_p2 = scmp.ne.s32.totalorder %s198_s2, %s126_s9  ;;  %p130_p3 = scmp.lt.u32.totalorder %s126_s9, %s198_s2 }
  0x3a   :  { %p132_p4 = pnand %p130_p3, %p127_p2 }
  0x3c   :  { %135 = shalt.err (!%p132_p4)
}
  0x3d   :  { %70 = dma.vmem_to_hbm [thread:$0]  %s68_s5, 256, %s198_s2, [#allocation4]  }
  0x3e   :  { %140 = dma.done.wait [#allocation4], 256  }
  0x3f   :  { %141 = vsyncadd [#allocation4], 4294967040 }
  0x40   :  { %74 = vsyncpa [#allocation3], 1 }
  0x41   :  { %75 = vsyncpa [#allocation4], 1 }
  0x42   :  { %76 = vsyncpa [#allocation5], 1 }

</bundles_post_ra>
